<compile_context>
chip_gen: v7x
topology: tpu7x:2x2x1
jax: 0.10.0
libtpu: 0.0.40
codegen_flags: <defaults>
</compile_context>

<pallas_src>
import jax
import jax.numpy as jnp
from jax.experimental import pallas as pl
from jax.experimental.pallas import tpu as pltpu


def _embed_kernel(p_ref, w_ref, posb_ref, cls_ref, o_ref):
    # p_ref:    (1, TN, patch_dim)  patches for this (batch, n-tile)
    # w_ref:    (patch_dim, dim)    resident (constant index map)
    # posb_ref: (TN, dim)           pos_embedding[1 + t*TN : ...] + bias (pre-folded)
    # cls_ref:  (1, dim)            cls_token + pos_embedding[0] (pre-combined)
    # o_ref:    (1, N+1, dim)       resident across the n-tile axis for this batch
    t = pl.program_id(1)
    tn = p_ref.shape[1]

    @pl.when(t == 0)
    def _():
        # Sequence row 0: batch-invariant cls token (+ pos row 0), written once
        # per batch element while the output block is resident in VMEM.
        o_ref[0, 0:1, :] = cls_ref[...].astype(o_ref.dtype)

    emb = jnp.dot(p_ref[0], w_ref[...], preferred_element_type=jnp.float32)
    # Direct store of this tile's body rows (rows 1 + t*TN .. 1 + (t+1)*TN - 1).
    o_ref[0, pl.ds(t * tn + 1, tn), :] = (emb + posb_ref[...]).astype(o_ref.dtype)


def _pick_tile_n(N, patch_dim, dim, in_bytes, out_bytes, budget_bytes,
                 max_tile=1024):
    """Largest multiple-of-8 divisor of N (or N itself) fitting the VMEM budget."""
    cands = {N}
    for c in range(8, N, 8):
        if N % c == 0:
            cands.add(c)
    cands = sorted(cands, reverse=True)

    fixed = (2 * patch_dim * dim * 4            # weight (conservatively x2)
             + 2 * (N + 1) * dim * out_bytes    # resident output (double-buffered)
             + 2 * dim * 4)                     # cls row

    def est(tn):
        return fixed + 2 * tn * patch_dim * in_bytes + 2 * tn * dim * 4

    for tn in cands:
        if tn <= max_tile and est(tn) <= budget_bytes:
            return tn, est(tn)
    tn = cands[-1]                               # smallest candidate as fallback
    return tn, est(tn)


def image_embedder_3d(img, w, b, cls_token, pos_embedding, *, patch_size,
                      tile_n=None):
    """Forward pass of ImageEmbedder3d.

    img:           (B, C, H, W, D), H == W == D == image_size
    w:             (patch_dim, dim)   (transposed nn.Linear weight)
    b:             (dim,)
    cls_token:     (1, 1, dim)
    pos_embedding: (1, >= num_patches + 1, dim)
    returns:       (B, num_patches + 1, dim)
    """
    B, C, H, W, D = img.shape
    P = patch_size
    h, wd, d = H // P, W // P, D // P
    N = h * wd * d
    patch_dim, dim = w.shape

    # einops: 'b c (h p1) (w p2) (d p3) -> b (h w d) (p1 p2 p3 c)'
    x = img.reshape(B, C, h, P, wd, P, d, P)
    x = jnp.transpose(x, (0, 2, 4, 6, 3, 5, 7, 1))   # b h w d p1 p2 p3 c
    patches = x.reshape(B, N, patch_dim)

    # Batch-invariant algebra hoisted out of the kernel:
    #   body rows get (pos + bias); row 0 gets (cls + pos[0]).
    pos = pos_embedding.reshape(-1, dim)[: N + 1]     # handles longer learned tables
    posb = (pos[1:] + b.reshape(1, dim)).astype(jnp.float32)              # (N, dim)
    cls_row = (cls_token.reshape(1, dim) + pos[0:1]).astype(jnp.float32)  # (1, dim)

    in_bytes = patches.dtype.itemsize
    out_bytes = img.dtype.itemsize
    budget = 48 * 1024 * 1024                         # headroom under v7x 64 MiB
    if tile_n is None:
        tile_n, est_bytes = _pick_tile_n(N, patch_dim, dim, in_bytes, out_bytes,
                                         budget)
    else:
        _, est_bytes = _pick_tile_n(N, patch_dim, dim, in_bytes, out_bytes, budget)
    assert N % tile_n == 0
    nt = N // tile_n

    vmem_limit = int(min(max(int(est_bytes * 1.5), 32 * 1024 * 1024),
                         64 * 1024 * 1024))

    out = pl.pallas_call(
        _embed_kernel,
        out_shape=jax.ShapeDtypeStruct((B, N + 1, dim), img.dtype),
        grid_spec=pltpu.PrefetchScalarGridSpec(
            num_scalar_prefetch=0,
            grid=(B, nt),
            in_specs=[
                pl.BlockSpec((1, tile_n, patch_dim), lambda bi, ti: (bi, ti, 0)),
                pl.BlockSpec((patch_dim, dim), lambda bi, ti: (0, 0)),
                pl.BlockSpec((tile_n, dim), lambda bi, ti: (ti, 0)),
                pl.BlockSpec((1, dim), lambda bi, ti: (0, 0)),
            ],
            # Same block index across the n-tile axis => output block stays
            # resident in VMEM for all tiles of a batch element.
            out_specs=pl.BlockSpec((1, N + 1, dim), lambda bi, ti: (bi, 0, 0)),
        ),
        compiler_params=pltpu.CompilerParams(
            dimension_semantics=("parallel", "arbitrary"),
            vmem_limit_bytes=vmem_limit,
        ),
    )(patches, w, posb, cls_row)
    # dropout(p=0.0) is the identity.
    return out


def _reference(img, w, b, cls_token, pos_embedding, *, patch_size):
    B, C, H, W, D = img.shape
    P = patch_size
    h, wd, d = H // P, W // P, D // P
    N = h * wd * d
    x = img.reshape(B, C, h, P, wd, P, d, P)
    x = jnp.transpose(x, (0, 2, 4, 6, 3, 5, 7, 1)).reshape(B, N, -1)
    emb = x @ w + b
    cls = jnp.broadcast_to(cls_token, (B, 1, w.shape[1]))
    seq = jnp.concatenate([cls, emb], axis=1)
    return seq + pos_embedding[:, : N + 1]


if __name__ == "__main__":
    # Small shapes consistent with the module.
    image_size = 8
    patch_size = 4
    channels = 2
    dim = 32
    batch = 2

    num_patches = (image_size // patch_size) ** 3          # 8
    patch_dim = channels * patch_size ** 3                 # 128

    key = jax.random.PRNGKey(0)
    k_img, k_w, k_b, k_cls, k_pos = jax.random.split(key, 5)

    img = jax.random.normal(
        k_img, (batch, channels, image_size, image_size, image_size),
        dtype=jnp.float32)
    # nn.Linear(patch_dim, dim): store weight pre-transposed as (patch_dim, dim)
    w = jax.random.normal(k_w, (patch_dim, dim), dtype=jnp.float32) * 0.02
    b = jax.random.normal(k_b, (dim,), dtype=jnp.float32) * 0.02
    cls_token = jax.random.normal(k_cls, (1, 1, dim), dtype=jnp.float32)
    pos_embedding = jax.random.normal(
        k_pos, (1, num_patches + 1, dim), dtype=jnp.float32)

    out = image_embedder_3d(img, w, b, cls_token, pos_embedding,
                            patch_size=patch_size)
    out = jax.block_until_ready(out)

    ref = _reference(img, w, b, cls_token, pos_embedding,
                     patch_size=patch_size)
    assert out.shape == (batch, num_patches + 1, dim), out.shape
    assert jnp.allclose(out, ref, atol=1e-5, rtol=1e-5), "mismatch vs reference"

    print("KERNEL_OK")
</pallas_src>

<mosaic_0001>
module attributes {stable_mosaic.version = 11 : i64} {
  func.func @_embed_kernel(%arg0: i32, %arg1: i32, %arg2: memref<1x8x128xf32, #tpu.memory_space<vmem>>, %arg3: memref<128x32xf32, #tpu.memory_space<vmem>>, %arg4: memref<8x32xf32, #tpu.memory_space<vmem>>, %arg5: memref<1x32xf32, #tpu.memory_space<vmem>>, %arg6: memref<1x9x32xf32, #tpu.memory_space<vmem>>) attributes {dimension_semantics = [#tpu.dimension_semantics<parallel>, #tpu.dimension_semantics<arbitrary>], iteration_bounds = array<i64: 2, 1>, scalar_prefetch = 0 : i64, scratch_operands = 0 : i64, tpu.core_type = #tpu.core_type<tc>, window_params = [{transform_indices = @transform_0, window_bounds = array<i64: 1, 8, 128>}, {pipeline_mode = #tpu.pipeline_mode<synchronous>, transform_indices = @transform_1, window_bounds = array<i64: 128, 32>}, {transform_indices = @transform_2, window_bounds = array<i64: 8, 32>}, {pipeline_mode = #tpu.pipeline_mode<synchronous>, transform_indices = @transform_3, window_bounds = array<i64: 1, 32>}, {transform_indices = @transform_4, window_bounds = array<i64: 1, 9, 32>}]} {
    %c0_i32 = arith.constant 0 : i32
    %0 = arith.cmpi eq, %arg1, %c0_i32 : i32
    %1 = arith.extui %0 : i1 to i32
    %c0_i32_0 = arith.constant 0 : i32
    %2 = arith.cmpi ne, %1, %c0_i32_0 : i32
    scf.if %2 {
      %c0_9 = arith.constant 0 : index
      %c0_10 = arith.constant 0 : index
      %15 = vector.load %arg5[%c0_9, %c0_10] : memref<1x32xf32, #tpu.memory_space<vmem>>, vector<1x32xf32>
      %c0_11 = arith.constant 0 : index
      %c0_12 = arith.constant 0 : index
      %c0_13 = arith.constant 0 : index
      %16 = vector.load %arg6[%c0_11, %c0_12, %c0_13] : memref<1x9x32xf32, #tpu.memory_space<vmem>>, vector<1x1x32xf32>
      %17 = vector.shape_cast %16 : vector<1x1x32xf32> to vector<1x32xf32>
      %18 = vector.shape_cast %15 : vector<1x32xf32> to vector<1x1x32xf32>
      tpu.vector_store %arg6[%c0_11, %c0_12, %c0_13], %18 {strides = array<i32>} : memref<1x9x32xf32, #tpu.memory_space<vmem>>, vector<1x1x32xf32>,
    } else {
    }
    %c0 = arith.constant 0 : index
    %c0_1 = arith.constant 0 : index
    %c0_2 = arith.constant 0 : index
    %3 = vector.load %arg2[%c0, %c0_1, %c0_2] : memref<1x8x128xf32, #tpu.memory_space<vmem>>, vector<1x8x128xf32>
    %4 = vector.shape_cast %3 : vector<1x8x128xf32> to vector<8x128xf32>
    %c0_3 = arith.constant 0 : index
    %c0_4 = arith.constant 0 : index
    %5 = vector.load %arg3[%c0_3, %c0_4] : memref<128x32xf32, #tpu.memory_space<vmem>>, vector<128x32xf32>
    %cst = arith.constant dense<0.000000e+00> : vector<8x32xf32>
    %6 = tpu.matmul %4, %5, %cst {dimension_numbers = #tpu.dot_dimension_numbers<[1], [0], [0], [1], [0, 0, 1, 1], [], []>} : vector<8x128xf32>, vector<128x32xf32>, vector<8x32xf32> -> vector<8x32xf32>
    %c0_5 = arith.constant 0 : index
    %c0_6 = arith.constant 0 : index
    %7 = vector.load %arg4[%c0_5, %c0_6] : memref<8x32xf32, #tpu.memory_space<vmem>>, vector<8x32xf32>
    %8 = arith.addf %6, %7 : vector<8x32xf32>
    %c8_i32 = arith.constant 8 : i32
    %9 = arith.muli %arg1, %c8_i32 : i32
    %c1_i32 = arith.constant 1 : i32
    %10 = arith.addi %9, %c1_i32 : i32
    %c0_7 = arith.constant 0 : index
    %11 = arith.index_cast %10 : i32 to index
    %c0_8 = arith.constant 0 : index
    %12 = vector.load %arg6[%c0_7, %11, %c0_8] : memref<1x9x32xf32, #tpu.memory_space<vmem>>, vector<1x8x32xf32>
    %13 = vector.shape_cast %12 : vector<1x8x32xf32> to vector<8x32xf32>
    %14 = vector.shape_cast %8 : vector<8x32xf32> to vector<1x8x32xf32>
    tpu.vector_store %arg6[%c0_7, %11, %c0_8], %14 {strides = array<i32>} : memref<1x9x32xf32, #tpu.memory_space<vmem>>, vector<1x8x32xf32>,
    return
  }
  func.func @transform_0(%arg0: i32, %arg1: i32) -> (i32, i32, i32) {
    %c0_i32 = arith.constant 0 : i32
    %c0_i32_0 = arith.constant 0 : i32
    return %arg0, %arg1, %c0_i32 : i32, i32, i32
  }
  func.func @transform_1(%arg0: i32, %arg1: i32) -> (i32, i32) {
    %c0_i32 = arith.constant 0 : i32
    %c0_i32_0 = arith.constant 0 : i32
    %c0_i32_1 = arith.constant 0 : i32
    return %c0_i32, %c0_i32_0 : i32, i32
  }
  func.func @transform_2(%arg0: i32, %arg1: i32) -> (i32, i32) {
    %c0_i32 = arith.constant 0 : i32
    %c0_i32_0 = arith.constant 0 : i32
    return %arg1, %c0_i32 : i32, i32
  }
  func.func @transform_3(%arg0: i32, %arg1: i32) -> (i32, i32) {
    %c0_i32 = arith.constant 0 : i32
    %c0_i32_0 = arith.constant 0 : i32
    %c0_i32_1 = arith.constant 0 : i32
    return %c0_i32, %c0_i32_0 : i32, i32
  }
  func.func @transform_4(%arg0: i32, %arg1: i32) -> (i32, i32, i32) {
    %c0_i32 = arith.constant 0 : i32
    %c0_i32_0 = arith.constant 0 : i32
    %c0_i32_1 = arith.constant 0 : i32
    return %arg0, %c0_i32, %c0_i32_0 : i32, i32, i32
  }
}

</mosaic_0001>

<bundles_post_ra>
// kernel: tpu_custom_call.1
= control target key start
LH: loop header
LB: loop body
LE: loop exit
PB: predicated region body
PF: predicated region fallthrough
CT: control target
= control target key end

     0   :  { %s588_s15 = smov 0   ;;  %s590_s16 = smov 0   ;;  %s683_s0 = inlined_call_operand.vmem [shape: f32[2,8,128], index: 0, kind: input, shape index: {}]   ;;  %s684_s1 = inlined_call_operand.vmem [shape: f32[128,32], index: 1, kind: input, shape index: {}]   ;;  %s685_s2 = inlined_call_operand.vmem [shape: f32[8,32], index: 2, kind: input, shape index: {}]   ;;  %s686_s3 = inlined_call_operand.vmem [shape: f32[1,32], index: 3, kind: input, shape index: {}]   ;;  %s687_s4 = inlined_call_operand.vmem [shape: f32[2,9,32], index: 4, kind: output, shape index: {}]  }
   0x1   :  { %s592_s17 = smov 0  }
   0x2 LB: > { %s26_s18 = sadd.s32 1, %s554_s16  ;;  %p425_p0 = scmp.ge.s32.totalorder %s558_s17, 1  ;;  %s558_s17 = sphi %s592_s17, %s14_s17   ;;  %s554_s16 = sphi %s590_s16, %s689_s16   ;;  %s550_s15 = sphi %s588_s15, %s688_s15  }
   0x3   : > { %p28_p1 = scmp.ge.s32.totalorder %s26_s18, 2  ;;  %p187_p2 = scmp.lt.s32.totalorder %s558_s17, 3 }
   0x5   : > { %s691_s18 = smov (%p28_p1, %s26_s18), 0  ;;  %p188_p3 = pnand %p425_p0, %p187_p2 }
   0x6   : > { %v243_v0 = vld [vmem:[%s684_s1] sm:$0xff] (!%p188_p3)  ;;  %v244_v1 = vld [vmem:[%s684_s1 + $0x8] sm:$0xff] (!%p188_p3)  ;;  %v245_v2 = vld [vmem:[%s684_s1 + $0x10] sm:$0xff] (!%p188_p3)  ;;  %v560_v3 = vmov (!%p188_p3), 0.0|0.0   ;;  %vm561_vm0 = vmmov (!%p188_p3), 0   ;;  %v562_v6 = vmov (!%p188_p3), 0.0  }
   0x7   : > { %191 = sbr.rel (%p188_p3) target bundleno = 255 (0xff), region = 36  ;;  %485 = vmatprep.subr.bf16.mxu0 (!%p188_p3), %v560_v3  ;;  %v486_v4 = vpack.c.bf16 (!%p188_p3), %v244_v1, %v243_v0  ;;  %v246_v5 = vld [vmem:[%s684_s1 + $0x18] sm:$0xff] (!%p188_p3)  ;;  %482 = vmatprep.mubr.msk.f32.mxu0 (!%p188_p3), %vm561_vm0, %v562_v6  ;;  %p219_p4 = scmp.lt.s32.totalorder (!%p188_p3), %s550_s15, 1  ;;  %v247_v8 = vld [vmem:[%s684_s1 + $0x20] sm:$0xff] (!%p188_p3)  ;;  %v248_v9 = vld [vmem:[%s684_s1 + $0x28] sm:$0xff] (!%p188_p3)  ;;  %vm240_vm1 = vcmask (!%p188_p3), 253952  }
   0x8   : > { %v489_v7 = vpack.c.bf16 (!%p188_p3), %v246_v5, %v245_v2  ;;  %v239_v10 = vld [vmem:[%s686_s3] sm:$0x1] (!%p188_p3)  ;;  %v492_v11 = vpack.c.bf16 (!%p188_p3), %v248_v9, %v247_v8  ;;  %v249_v12 = vld [vmem:[%s684_s1 + $0x30] sm:$0xff] (!%p188_p3)  ;;  %v250_v13 = vld [vmem:[%s684_s1 + $0x38] sm:$0xff] (!%p188_p3)  ;;  %vm333_vm2 = vcmask (!%p188_p3), 261120  }
   0x9   : > { %487 = vmatpush3.bf16.msra.mxu0 (!%p188_p3), %v486_v4  ;;  %v495_v14 = vpack.c.bf16 (!%p188_p3), %v250_v13, %v249_v12  ;;  %v251_v15 = vld [vmem:[%s684_s1 + $0x40] sm:$0xff] (!%p188_p3)  ;;  %v252_v16 = vld [vmem:[%s684_s1 + $0x48] sm:$0xff] (!%p188_p3)  ;;  %v253_v18 = vld [vmem:[%s684_s1 + $0x50] sm:$0xff] (!%p188_p3) }
   0xa   : > { %488 = vmatprep.subr.bf16.mxu0 (!%p188_p3), %v560_v3  ;;  %v498_v17 = vpack.c.bf16 (!%p188_p3), %v252_v16, %v251_v15  ;;  %v254_v19 = vld [vmem:[%s684_s1 + $0x58] sm:$0xff] (!%p188_p3)  ;;  %v255_v21 = vld [vmem:[%s684_s1 + $0x60] sm:$0xff] (!%p188_p3)  ;;  %v256_v22 = vld [vmem:[%s684_s1 + $0x68] sm:$0xff] (!%p188_p3) }
   0xb   : > { %v501_v20 = vpack.c.bf16 (!%p188_p3), %v254_v19, %v253_v18  ;;  %v504_v23 = vpack.c.bf16 (!%p188_p3), %v256_v22, %v255_v21  ;;  %v257_v24 = vld [vmem:[%s684_s1 + $0x70] sm:$0xff] (!%p188_p3)  ;;  %v258_v25 = vld [vmem:[%s684_s1 + $0x78] sm:$0xff] (!%p188_p3)  ;;  %v259_v28 = vld [vmem:[%s685_s2] sm:$0xff] (!%p188_p3) }
   0xc   : > { %v507_v26 = vpack.c.bf16 (!%p188_p3), %v258_v25, %v257_v24 }
   0xd   : > { %490 = vmatpush3.bf16.msra.mxu0 (!%p188_p3), %v489_v7 }
   0xe   : > { %s693_s15 = smov (!%p219_p4, %s550_s15), 1  ;;  %491 = vmatprep.subr.bf16.mxu0 %v560_v3 }
   0xf   : > { %s432_s5 = sshll.u32 %s693_s15, 4  ;;  %s426_s9 = sshll.u32 %s693_s15, 3 }
  0x10   : > { %s633_s10 = scalar_lea.vmem %s687_s4, %s432_s5  ;;  %s225_s13 = scalar_lea.vmem %s683_s0, %s426_s9 }
  0x11   : > { %241 = vst.msk [vmem:[%s633_s10] sm:$0x1] %vm240_vm1, %v239_v10  ;;  %493 = vmatpush3.bf16.msra.mxu0 %v492_v11  ;;  %v242_v27 = vld [vmem:[%s225_s13] sm:$0xff] }
  0x12   : > { %494 = vmatprep.subr.bf16.mxu0 %v560_v3 }
  0x15   : > { %496 = vmatpush3.bf16.msra.mxu0 %v495_v14 }
  0x16   : > { %497 = vmatprep.subr.bf16.mxu0 %v560_v3 }
  0x19   : > { %499 = vmatpush3.bf16.msra.mxu0 %v498_v17 }
  0x1a   : > { %500 = vmatprep.subr.bf16.mxu0 %v560_v3 }
  0x1d   : > { %502 = vmatpush3.bf16.msra.mxu0 %v501_v20 }
  0x1e   : > { %503 = vmatprep.subr.bf16.mxu0 %v560_v3 }
  0x21   : > { %505 = vmatpush3.bf16.msra.mxu0 %v504_v23 }
  0x22   : > { %506 = vmatprep.subr.bf16.mxu0 %v560_v3 }
  0x25   : > { %508 = vmatpush3.bf16.msra.mxu0 %v507_v26 }
  0x28   : > { %483 = vmatmul.mubr.f32.vlgmr.msra.gmra.mrb[0].mxu0 %v242_v27 }
  0xfb   : > { %v326_v29 = vpop.f32.mrb[0].mxu0 }
  0xfc   : > { %v327_v30 = vadd.f32 %v326_v29, %v259_v28  ;;  %v484_v31 = vpop.f32.mrb[1].mxu0 }
  0xfe   : > { %429 = vst.msk [vmem:[%s633_s10 + $0x1] sm:$0xff] %vm333_vm2, %v327_v30 }
  0xff PF: > { %s14_s17 = sadd.s32 1, %s558_s17   ;;  %s688_s15 = smov %s554_s16 }
 0x100   : > { %p11_p5 = scmp.ge.s32.totalorder %s14_s17, 4   ;;  %s689_s16 = smov %s691_s18 }
 0x102   :  { %13 = sbr.rel (!%p11_p5) target bundleno = 2 (0x2), region = 74 }

</bundles_post_ra>
